<compile_context>
chip_gen: v6e
topology: v6e:2x2x1
jax: 0.10.0
libtpu: 0.0.40
codegen_flags: <defaults>
</compile_context>

<pallas_src>
import jax
import jax.numpy as jnp
from jax.experimental import pallas as pl
from jax.experimental.pallas import tpu as pltpu


def _noise_scale_kernel(u1_ref, u2_ref, scale_ref, out_ref):
    # u1_ref, u2_ref: (BR, BC//2) f32 uniforms in [0, 1)
    # scale_ref:      (BR, 1)     f32 per-row (per-channel) scale
    # out_ref:        (BR, BC)    f32 output tile
    u1 = jnp.maximum(u1_ref[...], 1e-7)   # avoid log(0); negligibly truncates the tail
    u2 = u2_ref[...]

    # Box-Muller: two independent standard-normal fields from one (u1, u2) pair.
    r = jnp.sqrt(-2.0 * jnp.log(u1))
    theta = (2.0 * jnp.pi) * u2

    scale = scale_ref[...]                 # (BR, 1) broadcasts over lanes
    half = out_ref.shape[-1] // 2          # static; multiple of 128 (or full dim)
    out_ref[:, :half] = (r * jnp.cos(theta)) * scale
    out_ref[:, half:] = (r * jnp.sin(theta)) * scale


def _pick_block(dim, quantum, max_block):
    """Largest multiple of `quantum` that divides `dim`, capped at `max_block`.
    Falls back to the full dim (always a legal block shape)."""
    if dim <= max_block:
        return dim
    b = (max_block // quantum) * quantum
    while b >= quantum:
        if dim % b == 0:
            return b
        b -= quantum
    return dim


def b_forward(t_shape, scale_param, key):
    """Pallas implementation of B.forward.

    t_shape:     (N, C, H, W) -- only the shape matters (noise = randn_like(t))
    scale_param: (1, C, 1, 1) float32
    key:         jax PRNG key for the noise
    returns:     (N, C, H, W) float32
    """
    N, C, H, W = t_shape
    rows, cols = N * C, H * W
    assert cols % 2 == 0, "H*W must be even for the two-output Box-Muller split"

    # Per-row scale: row r = n*C + c -> scale_param[0, c, 0, 0].  Tiny (N*C elems).
    scale_rows = jnp.broadcast_to(
        jnp.reshape(scale_param, (1, C)).astype(jnp.float32), (N, C)
    ).reshape(rows, 1)

    # Uniform entropy: each half the output size, since both Box-Muller outputs
    # (cos and sin) are consumed.
    k1, k2 = jax.random.split(key)
    u1 = jax.random.uniform(k1, (rows, cols // 2), dtype=jnp.float32)
    u2 = jax.random.uniform(k2, (rows, cols // 2), dtype=jnp.float32)

    # Tile sizes: 8-aligned rows, 256-aligned lane blocks (so the half-tile stays
    # a multiple of 128 lanes).  Caps keep the double-buffered working set well
    # inside the default scoped VMEM on v5e/v6e/v7x.
    block_rows = _pick_block(rows, 8, 256)
    block_cols = _pick_block(cols, 256, 2048)
    grid = (rows // block_rows, cols // block_cols)

    out2d = pl.pallas_call(
        _noise_scale_kernel,
        out_shape=jax.ShapeDtypeStruct((rows, cols), jnp.float32),
        grid=grid,
        in_specs=[
            pl.BlockSpec((block_rows, block_cols // 2), lambda i, j: (i, j)),
            pl.BlockSpec((block_rows, block_cols // 2), lambda i, j: (i, j)),
            pl.BlockSpec((block_rows, 1), lambda i, j: (i, 0)),
        ],
        out_specs=pl.BlockSpec((block_rows, block_cols), lambda i, j: (i, j)),
        compiler_params=pltpu.CompilerParams(
            dimension_semantics=("parallel", "parallel")
        ),
    )(u1, u2, scale_rows)

    # (N*C, H*W) -> (N, C, H, W): row-major reshape only, no transpose.
    return out2d.reshape(N, C, H, W)


if __name__ == "__main__":
    key = jax.random.PRNGKey(0)
    k_t, k_scale, k_noise = jax.random.split(key, 3)

    # Small NCHW shape consistent with the module's conv-style input.
    N, C, H, W = 2, 4, 16, 16
    t = jax.random.normal(k_t, (N, C, H, W), dtype=jnp.float32)
    # nn.Parameter(torch.randn([1, in_channels, 1, 1])) -> deterministic init here.
    scale_param = jax.random.normal(k_scale, (1, C, 1, 1), dtype=jnp.float32)

    out = b_forward(t.shape, scale_param, k_noise)
    out = jax.block_until_ready(out)

    assert out.shape == t.shape, (out.shape, t.shape)
    assert out.dtype == jnp.float32
    assert bool(jnp.all(jnp.isfinite(out)))
    # Sanity: each channel is (standard normal) * scale_c, so its spread is bounded.
    per_ch_std = jnp.std(out, axis=(0, 2, 3))
    assert bool(jnp.all(per_ch_std < jnp.abs(scale_param[0, :, 0, 0]) * 2.0 + 1.0))

    print("KERNEL_OK")
</pallas_src>

<mosaic_0001>
module attributes {stable_mosaic.version = 11 : i64} {
  func.func @_noise_scale_kernel(%arg0: i32, %arg1: i32, %arg2: memref<8x128xf32, #tpu.memory_space<vmem>>, %arg3: memref<8x128xf32, #tpu.memory_space<vmem>>, %arg4: memref<8x1xf32, #tpu.memory_space<vmem>>, %arg5: memref<8x256xf32, #tpu.memory_space<vmem>>) attributes {dimension_semantics = [#tpu.dimension_semantics<parallel>, #tpu.dimension_semantics<parallel>], iteration_bounds = array<i64: 1, 1>, scalar_prefetch = 0 : i64, scratch_operands = 0 : i64, tpu.core_type = #tpu.core_type<tc>, window_params = [{transform_indices = @transform_0, window_bounds = array<i64: 8, 128>}, {transform_indices = @transform_1, window_bounds = array<i64: 8, 128>}, {transform_indices = @transform_2, window_bounds = array<i64: 8, 1>}, {transform_indices = @transform_3, window_bounds = array<i64: 8, 256>}]} {
    %c0 = arith.constant 0 : index
    %c0_0 = arith.constant 0 : index
    %0 = vector.load %arg2[%c0, %c0_0] : memref<8x128xf32, #tpu.memory_space<vmem>>, vector<8x128xf32>
    %cst = arith.constant 1.000000e-07 : f32
    %1 = vector.broadcast %cst : f32 to vector<8x128xf32>
    %2 = arith.maximumf %0, %1 : vector<8x128xf32>
    %c0_1 = arith.constant 0 : index
    %c0_2 = arith.constant 0 : index
    %3 = vector.load %arg3[%c0_1, %c0_2] : memref<8x128xf32, #tpu.memory_space<vmem>>, vector<8x128xf32>
    %4 = math.log %2 : vector<8x128xf32>
    %cst_3 = arith.constant -2.000000e+00 : f32
    %5 = vector.broadcast %cst_3 : f32 to vector<8x128xf32>
    %6 = arith.mulf %5, %4 : vector<8x128xf32>
    %7 = math.sqrt %6 : vector<8x128xf32>
    %cst_4 = arith.constant 6.28318548 : f32
    %8 = vector.broadcast %cst_4 : f32 to vector<8x128xf32>
    %9 = arith.mulf %8, %3 : vector<8x128xf32>
    %c0_5 = arith.constant 0 : index
    %c0_6 = arith.constant 0 : index
    %10 = vector.load %arg4[%c0_5, %c0_6] : memref<8x1xf32, #tpu.memory_space<vmem>>, vector<8x1xf32>
    %11 = math.cos %9 : vector<8x128xf32>
    %12 = arith.mulf %7, %11 : vector<8x128xf32>
    %13 = vector.broadcast %10 : vector<8x1xf32> to vector<8x128xf32>
    %14 = arith.mulf %12, %13 : vector<8x128xf32>
    %c0_7 = arith.constant 0 : index
    %c0_8 = arith.constant 0 : index
    %15 = vector.load %arg5[%c0_7, %c0_8] : memref<8x256xf32, #tpu.memory_space<vmem>>, vector<8x128xf32>
    tpu.vector_store %arg5[%c0_7, %c0_8], %14 {strides = array<i32>} : memref<8x256xf32, #tpu.memory_space<vmem>>, vector<8x128xf32>,
    %16 = math.sin %9 : vector<8x128xf32>
    %17 = arith.mulf %7, %16 : vector<8x128xf32>
    %18 = vector.broadcast %10 : vector<8x1xf32> to vector<8x128xf32>
    %19 = arith.mulf %17, %18 : vector<8x128xf32>
    %c0_9 = arith.constant 0 : index
    %c128 = arith.constant 128 : index
    %20 = vector.load %arg5[%c0_9, %c128] : memref<8x256xf32, #tpu.memory_space<vmem>>, vector<8x128xf32>
    tpu.vector_store %arg5[%c0_9, %c128], %19 {strides = array<i32>} : memref<8x256xf32, #tpu.memory_space<vmem>>, vector<8x128xf32>,
    return
  }
  func.func @transform_0(%arg0: i32, %arg1: i32) -> (i32, i32) {
    %c0_i32 = arith.constant 0 : i32
    return %arg0, %arg1 : i32, i32
  }
  func.func @transform_1(%arg0: i32, %arg1: i32) -> (i32, i32) {
    %c0_i32 = arith.constant 0 : i32
    return %arg0, %arg1 : i32, i32
  }
  func.func @transform_2(%arg0: i32, %arg1: i32) -> (i32, i32) {
    %c0_i32 = arith.constant 0 : i32
    %c0_i32_0 = arith.constant 0 : i32
    return %arg0, %c0_i32 : i32, i32
  }
  func.func @transform_3(%arg0: i32, %arg1: i32) -> (i32, i32) {
    %c0_i32 = arith.constant 0 : i32
    return %arg0, %arg1 : i32, i32
  }
}

</mosaic_0001>

<bundles_post_ra>
// kernel: tpu_custom_call.1
= control target key start
LH: loop header
LB: loop body
LE: loop exit
PB: predicated region body
PF: predicated region fallthrough
CT: control target
= control target key end

     0   :  { %8 = vsyncpa [#allocation3], 0  ;;  %s411_s0 = inlined_call_operand.vmem [shape: f32[8,128], index: 0, kind: input, shape index: {}]   ;;  %s412_s1 = inlined_call_operand.hbm [shape: f32[8,128], index: 1, kind: input, shape index: {}]   ;;  %s413_s2 = inlined_call_operand.vmem [shape: f32[8,1], index: 2, kind: input, shape index: {}]   ;;  %s414_s3 = inlined_call_operand.hbm [shape: f32[8,256], index: 3, kind: output, shape index: {}]  }
   0x1   :  { %9 = vsyncpa [#allocation4], 0  ;;  %s349_s12 = smov [#allocation2]  }
   0x2   :  { %s18_s13 = sshll.u32 %s349_s12, 4  ;;  %s19_s13 = int_to_ptr.vmem [resolvable:$true] %s18_s13 }
   0x3   :  { %s313_s14 = scalar_lea.vmem %s19_s13, 128  ;;  %p318_p1 = scmp.lt.s32.totalorder %s19_s13, %s19_s13 }
   0x4   :  { %p314_p0 = scmp.ne.s32.totalorder %s19_s13, %s313_s14  ;;  %p319_p2 = scmp.lt.s32.totalorder %s313_s14, %s313_s14 }
   0x6   :  { %p320_p3 = por %p319_p2, %p318_p1 }
   0x8   :  { %p321_p4 = pnand %p320_p3, %p314_p0 }
   0xa   :  { %324 = shalt.err (!%p321_p4)
}
   0xb   :  { %21 = dma.hbm_to_vmem [thread:$0]  %s412_s1, 128, %s19_s13, [#allocation3]  }
   0xc   :  { %345 = dma.done.wait [#allocation3], 128  }
   0xd   :  { %346 = vsyncadd [#allocation3], 4294967168  ;;  %v350_v0 = vmov 0   ;;  %v41_v1 = vld [vmem:[%s413_s2] sm:$0xff]  ;;  %v351_v14 = vmov 683565275  }
   0xe   :  { %296 = vset.pattern.permute.xlu0 %v350_v0  ;;  %v29_v2 = vld [vmem:[#allocation2] sm:$0xff]  ;;  %v352_v16 = vmov 2475754826   ;;  %v353_v18 = vmov 2131351028  }
   0xf   :  { %148 = vperm.xlu0 %296, %v41_v1   ;;  %v384_v3 = vmul.f32 6.2831855, %v29_v2  ;;  %v354_v20 = vmov 2102212464   ;;  %v355_v22 = vmov 920167782  }
  0x10   :  { %v356_v30 = vmov 1326507024  }
  0x11   :  { %v45_v4 = vand.u32 2139095040, %v384_v3  ;;  %v42_v7 = vand.u32 2147483647, %v384_v3  ;;  %vm44_vm7 = vcmp.lt.s32.totalorder %v384_v3, 0 }
  0x13   :  { %v46_v5 = vshrl.u32 %v45_v4, 23  ;;  %v49_v10 = vand.u32 8388607, %v42_v7  ;;  %vm43_vm8 = vcmp.le.f32.partialorder %v42_v7, 0.7853982 }
  0x15   :  { %v275_v6 = vadd.s32 4294967169, %v46_v5  ;;  %v50_v24 = vor.u32 8388608, %v49_v10 }
  0x17   :  { %v52_v8 = vadd.s32 1, %v275_v6  ;;  %v90_v37 = vshll.u32 %v50_v24, 8 }
  0x19   :  { %vm53_vm0 = vcmp.gt.s32.totalorder %v52_v8, 0 }
  0x1a   :  { %v54_v9 = vsel %vm53_vm0, %v52_v8, 0  ;;  %vm134_vm0 = vweird.f32 %v384_v3 }
  0x1b   :  { %v56_v11 = vand.u32 31, %v54_v9  ;;  %v55_v12 = vshrl.u32 %v54_v9, 5  ;;  %v27_v9 = vld [vmem:[%s411_s0] sm:$0xff]  ;;  %s357_s0 = smov [#allocation5]  }
  0x1c   :  { %s266_s19 = sshll.u32 %s357_s0, 4  ;;  %s267_s19 = int_to_ptr.vmem [resolvable:$true] %s266_s19 }
  0x1d   :  { %v57_v13 = vsub.s32 32, %v56_v11  ;;  %v59_v15 = vshll.u32 %v351_v14, %v56_v11  ;;  %v62_v17 = vshll.u32 %v352_v16, %v56_v11  ;;  %v65_v19 = vshll.u32 %v353_v18, %v56_v11  ;;  %s325_s20 = scalar_lea.vmem %s267_s19, 256  ;;  %p330_p6 = scmp.lt.s32.totalorder %s267_s19, %s267_s19 }
  0x1e   :  { %v68_v21 = vshll.u32 %v354_v20, %v56_v11  ;;  %v71_v23 = vshll.u32 %v355_v22, %v56_v11  ;;  %vm74_vm1 = vcmp.lt.s32.totalorder %v55_v12, 1  ;;  %vm77_vm2 = vcmp.lt.s32.totalorder %v55_v12, 4  ;;  %p326_p5 = scmp.ne.s32.totalorder %s267_s19, %s325_s20  ;;  %p331_p7 = scmp.lt.s32.totalorder %s325_s20, %s325_s20 }
  0x1f   :  { %v60_v25 = vshrl.u32 %v352_v16, %v57_v13  ;;  %v63_v26 = vshrl.u32 %v353_v18, %v57_v13  ;;  %v58_v27 = vshrl.u32 %v351_v14, %v57_v13  ;;  %v66_v28 = vshrl.u32 %v354_v20, %v57_v13 }
  0x20   :  { %v69_v29 = vshrl.u32 %v355_v22, %v57_v13  ;;  %v72_v31 = vshrl.u32 %v356_v30, %v57_v13  ;;  %vm76_vm3 = vcmp.lt.s32.totalorder %v55_v12, 3  ;;  %vm75_vm4 = vcmp.lt.s32.totalorder %v55_v12, 2  ;;  %p332_p8 = por %p331_p7, %p330_p6 }
  0x21   :  { %v61_v32 = vor.u32 %v60_v25, %v59_v15  ;;  %v64_v33 = vor.u32 %v63_v26, %v62_v17  ;;  %v67_v34 = vor.u32 %v66_v28, %v65_v19  ;;  %v28_v13 = vmax.f32 %v27_v9, 1e-07 }
  0x22   :  { %v70_v35 = vor.u32 %v69_v29, %v68_v21  ;;  %v73_v36 = vor.u32 %v72_v31, %v71_v23  ;;  %p333_p9 = pnand %p332_p8, %p326_p5 }
  0x23   :  { %v78_v38 = vsel %vm74_vm1, %v58_v27, %v61_v32  ;;  %v79_v39 = vsel %vm77_vm2, %v67_v34, 2102212464  ;;  %v82_v40 = vsel %vm74_vm1, %v61_v32, %v64_v33  ;;  %v86_v44 = vsel %vm74_vm1, %v64_v33, %v67_v34 }
  0x24   :  { %v83_v41 = vsel %vm77_vm2, %v70_v35, 920167782  ;;  %v80_v42 = vsel %vm76_vm3, %v64_v33, %v79_v39  ;;  %v87_v45 = vsel %vm77_vm2, %v73_v36, 1326507024  ;;  %297 = vlog2.f32 %v28_v13 }
  0x25   :  { %v84_v43 = vsel %vm76_vm3, %v67_v34, %v83_v41  ;;  %v88_v47 = vsel %vm76_vm3, %v70_v35, %v87_v45  ;;  %v81_v48 = vsel %vm75_vm4, %v78_v38, %v80_v42 }
  0x26   :  { %v85_v46 = vsel %vm75_vm4, %v82_v40, %v84_v43  ;;  %v89_v49 = vsel %vm75_vm4, %v86_v44, %v88_v47  ;;  %v97_v54 = vmul.u32 %v90_v37, %v81_v48 }
  0x27   :  { %v390_v50 = vmul.u32.u64.low %v90_v37, %v85_v46  ;;  %v391_v51 = vmul.u32.u64.high %v90_v37, %v85_v46, %v390_v50  ;;  %v393_v52 = vmul.u32.u64.low %v90_v37, %v89_v49  ;;  %v394_v53 = vmul.u32.u64.high %v90_v37, %v89_v49, %v393_v52 }
  0x29   :  { %v100_v55 = vadd.s32 1, %v391_v51  ;;  %vm99_vm5 = vc.u32 %v394_v53, %v390_v50  ;;  %v98_v5 = vadd.s32 %v390_v50, %v394_v53 }
  0x2b   :  { %v101_v56 = vsel %vm99_vm5, %v100_v55, %v391_v51 }
  0x2c   :  { %v102_v57 = vadd.s32 %v101_v56, %v97_v54 }
  0x2e   :  { %v103_v58 = vadd.s32 536870912, %v102_v57 }
  0x30   :  { %v104_v59 = vshrl.u32 %v103_v58, 30 }
  0x31   :  { %v298_v20 = vpop.eup %297 }
  0x32   :  { %v105_v60 = vshll.u32 %v104_v59, 30  ;;  %v31_v22 = vmul.f32 0.6931472, %v298_v20  ;;  %v128_v25 = vsub.s32 4, %v104_v59 }
  0x34   :  { %v106_v61 = vsub.s32 %v102_v57, %v105_v60  ;;  %v32_v24 = vmul.f32 -2.0, %v31_v22  ;;  %v129_v26 = vsel %vm44_vm7, %v128_v25, %v104_v59 }
  0x35   :  { %v131_v27 = vsel %vm43_vm8, 0, %v129_v26 }
  0x36   :  { %v108_v62 = vsub.s32 0, %v106_v61  ;;  %v246_v28 = vadd.s32 3, %v131_v27  ;;  %v135_v31 = vand.u32 3, %v131_v27  ;;  %vm35_vm13 = vcmp.eq.f32.partialorder %v32_v24, inf }
  0x37   :  { %v38_v40 = vand.u32 2147483648, %v32_v24  ;;  %vm37_vm1 = vcmp.eq.f32.partialorder %v32_v24, 0.0 }
  0x38   :  { %v276_v63 = vmin.u32 %v108_v62, %v106_v61  ;;  %v247_v32 = vand.u32 3, %v246_v28  ;;  %vm137_vm9 = vcmp.eq.s32.totalorder %v135_v31, 0  ;;  %vm140_vm10 = vcmp.eq.s32.totalorder %v135_v31, 2 }
  0x39   :  { %vm136_vm14 = vcmp.lt.s32.totalorder %v135_v31, 2 }
  0x3a   :  { %v110_v0 = vclz %v276_v63  ;;  %vm249_vm11 = vcmp.eq.s32.totalorder %v247_v32, 0  ;;  %vm252_vm12 = vcmp.eq.s32.totalorder %v247_v32, 2  ;;  %vm248_vm15 = vcmp.lt.s32.totalorder %v247_v32, 2 }
  0x3c   :  { %v277_v1 = vadd.s32 4294967294, %v110_v0 }
  0x3e   :  { %vm278_vm6 = vcmp.lt.s32.totalorder %v277_v1, 0 }
  0x3f   :  { %v113_v2 = vsel %vm278_vm6, 0, %v277_v1 }
  0x40   :  { %v118_v4 = vsub.s32 4294967266, %v113_v2  ;;  %v114_v6 = vsub.s32 32, %v113_v2  ;;  %v115_v10 = vshll.u32 %v106_v61, %v113_v2 }
  0x42   :  { %v119_v8 = vadd.s32 127, %v118_v4  ;;  %v116_v11 = vshrl.u32 %v98_v5, %v114_v6 }
  0x44   :  { %v120_v12 = vshll.u32 %v119_v8, 23  ;;  %v117_v14 = vor.u32 %v116_v11, %v115_v10 }
  0x46   :  { %v121_v15 = vor.u32 4788187, %v120_v12  ;;  %v124_v17 = vcvt.s32.f32 %v117_v14 }
  0x48   :  { %v122_v16 = vand.u32 2147483647, %v121_v15 }
  0x4a   :  { %v125_v18 = vmul.f32 %v124_v17, %v122_v16 }
  0x4c   :  { %v126_v19 = vxor.u32 2147483648, %v125_v18 }
  0x4e   :  { %v127_v21 = vsel %vm44_vm7, %v126_v19, %v125_v18 }
  0x4f   :  { %v130_v23 = vsel %vm43_vm8, %v384_v3, %v127_v21 }
  0x50   :  { %299 = vcosq.f32 %v130_v23 }
  0x51   :  { %301 = vsinq.f32 %v130_v23 }
  0x52   :  { %303 = vrsqrt.f32 %v32_v24 }
  0x5d   :  { %v300_v29 = vpop.eup %299 }
  0x5e   :  { %v302_v30 = vpop.eup %301  ;;  %v141_v35 = vxor.u32 2147483648, %v300_v29 }
  0x5f   :  { %v304_v33 = vpop.eup %303  ;;  %v138_v34 = vxor.u32 2147483648, %v302_v30 }
  0x60   :  { %v34_v7 = vmul.f32 %v304_v33, %v32_v24  ;;  %v142_v37 = vsel %vm140_vm10, %v141_v35, %v302_v30  ;;  %v254_v39 = vsel %vm252_vm12, %v141_v35, %v302_v30 }
  0x61   :  { %v139_v36 = vsel %vm137_vm9, %v300_v29, %v138_v34  ;;  %v251_v38 = vsel %vm249_vm11, %v300_v29, %v138_v34 }
  0x62   :  { %v36_v41 = vsel %vm35_vm13, %v32_v24, %v34_v7  ;;  %v143_v42 = vsel %vm136_vm14, %v139_v36, %v142_v37  ;;  %v255_v43 = vsel %vm248_vm15, %v251_v38, %v254_v39 }
  0x63   :  { %v39_v44 = vsel %vm37_vm1, %v38_v40, %v36_v41  ;;  %v144_v45 = vsel %vm134_vm0, nan, %v143_v42  ;;  %v256_v46 = vsel %vm134_vm0, nan, %v255_v43 }
  0x64   :  { %v145_v47 = vmul.f32 %v144_v45, %v39_v44  ;;  %v257_v48 = vmul.f32 %v256_v46, %v39_v44 }
  0x8a   :  { %v149_v49 = vpop.permute.xlu0 %148 }
  0x8b   :  { %v151_v50 = vmul.f32 %v149_v49, %v145_v47  ;;  %v258_v51 = vmul.f32 %v257_v48, %v149_v49 }
  0x8d   :  { %152 = vst [vmem:[#allocation5] sm:$0xff] %v151_v50  ;;  %259 = vst [vmem:[#allocation5 + $0x8] sm:$0xff] %v258_v51 }
  0x8e   :  { %336 = shalt.err (!%p333_p9)
}
  0x8f   :  { %269 = dma.vmem_to_hbm [thread:$0]  %s267_s19, 256, %s414_s3, [#allocation4]  }
  0x90   :  { %347 = dma.done.wait [#allocation4], 256  }
  0x91   :  { %348 = vsyncadd [#allocation4], 4294967040 }
  0x92   :  { %273 = vsyncpa [#allocation3], 1 }
  0x93   :  { %274 = vsyncpa [#allocation4], 1 }

</bundles_post_ra>
